<compile_context>
chip_gen: v6e
topology: v6e:2x2x1
jax: 0.10.0
libtpu: 0.0.40
codegen_flags: <defaults>
</compile_context>

<pallas_src>
import jax
import jax.numpy as jnp
from jax.experimental import pallas as pl
from jax.experimental.pallas import tpu as pltpu

PAD = 128    # lane-dense padded width for hidden feature dims
N_OUT = 6    # true output width (fc_output)


def dqn_mlp_kernel(x_ref, w1_ref, b1_ref, w2_ref, b2_ref, w3_ref, b3_ref, o_ref):
    # fc1 + ReLU : (tb,128) @ (128,128) -> (tb,128); padded cols stay exactly 0.
    h1 = jnp.dot(x_ref[...], w1_ref[...], preferred_element_type=jnp.float32)
    h1 = jnp.maximum(h1 + b1_ref[...], 0.0)
    # fc2 + ReLU
    h2 = jnp.dot(h1, w2_ref[...], preferred_element_type=jnp.float32)
    h2 = jnp.maximum(h2 + b2_ref[...], 0.0)
    # fc_output (no activation).  One MXU pass produces all 128 (mostly-zero)
    # columns; only the 6 real ones are stored -> 24 B/row of output HBM traffic.
    out = jnp.dot(h2, w3_ref[...], preferred_element_type=jnp.float32)
    out = out + b3_ref[...]
    o_ref[...] = out[:, :N_OUT].astype(o_ref.dtype)


def _round_up(n, m):
    return ((n + m - 1) // m) * m


def dqn_net_forward(x, padded_params, *, block_b=8192):
    """x: [B, 128] float32 -> [B, 6] float32 (uses 128-padded params)."""
    w1, b1, w2, b2, w3, b3 = padded_params
    B, K = x.shape
    assert K == 128, K

    # Batch tile: multiple of 8 (f32 sublanes), capped at block_b.  At 8192
    # rows the double-buffered tiles fit every generation's scoped-VMEM default.
    tb = min(block_b, _round_up(B, 8))
    grid = (pl.cdiv(B, tb),)   # ragged last block handled by Pallas masking

    resident = lambda shape: pl.BlockSpec(shape, lambda i: (0, 0))  # stays in VMEM

    out = pl.pallas_call(
        dqn_mlp_kernel,
        out_shape=jax.ShapeDtypeStruct((B, N_OUT), jnp.float32),
        grid=grid,
        in_specs=[
            pl.BlockSpec((tb, 128), lambda i: (i, 0)),   # x: streamed per batch tile
            resident(w1.shape), resident(b1.shape),
            resident(w2.shape), resident(b2.shape),
            resident(w3.shape), resident(b3.shape),
        ],
        # Last dim 6 == full array dim -> legal narrow block; contiguous HBM rows.
        out_specs=pl.BlockSpec((tb, N_OUT), lambda i: (i, 0)),
        compiler_params=pltpu.CompilerParams(
            dimension_semantics=("parallel",)),  # batch rows are independent
    )(x, w1, b1, w2, b2, w3, b3)
    return out


def init_params(key):
    """nn.Linear-style init: U(-1/sqrt(fan_in), 1/sqrt(fan_in)).

    Weights stored as (in, out); biases as (1, out).
    """
    def linear(key, fan_in, fan_out):
        kw, kb = jax.random.split(key)
        bound = 1.0 / jnp.sqrt(fan_in)
        w = jax.random.uniform(kw, (fan_in, fan_out), jnp.float32, -bound, bound)
        b = jax.random.uniform(kb, (1, fan_out), jnp.float32, -bound, bound)
        return w, b

    k1, k2, k3 = jax.random.split(key, 3)
    w1, b1 = linear(k1, 128, 24)
    w2, b2 = linear(k2, 24, 24)
    w3, b3 = linear(k3, 24, 6)
    return (w1, b1, w2, b2, w3, b3)


def pad_params(params):
    """Zero-pad all hidden/output feature dims to 128 (done once, not per call)."""
    w1, b1, w2, b2, w3, b3 = params

    def pad2(a, rows, cols):
        return jnp.pad(a, ((0, rows - a.shape[0]), (0, cols - a.shape[1])))

    return (
        pad2(w1, 128, PAD), pad2(b1, 1, PAD),   # fc1:       (128,128), (1,128)
        pad2(w2, PAD, PAD), pad2(b2, 1, PAD),   # fc2:       (128,128), (1,128)
        pad2(w3, PAD, PAD), pad2(b3, 1, PAD),   # fc_output: (128,128), (1,128)
    )


def reference_forward(x, params):
    w1, b1, w2, b2, w3, b3 = params
    h1 = jnp.maximum(x @ w1 + b1, 0.0)
    h2 = jnp.maximum(h1 @ w2 + b2, 0.0)
    return h2 @ w3 + b3


if __name__ == "__main__":
    key = jax.random.PRNGKey(0)
    k_params, k_x = jax.random.split(key)

    params = init_params(k_params)
    padded_params = pad_params(params)

    # Small example consistent with the module: batch=2, features=128.
    x = jax.random.normal(k_x, (2, 128), jnp.float32)

    out = dqn_net_forward(x, padded_params)
    out = jax.block_until_ready(out)

    ref = reference_forward(x, params)
    assert out.shape == (2, 6), out.shape
    assert jnp.allclose(out, ref, atol=1e-5, rtol=1e-5), "mismatch vs reference"

    # Larger, non-tile-aligned batch exercises the ragged-last-block grid path.
    xb = jax.random.normal(jax.random.PRNGKey(1), (2050, 128), jnp.float32)
    outb = jax.block_until_ready(dqn_net_forward(xb, padded_params, block_b=1024))
    refb = reference_forward(xb, params)
    assert outb.shape == (2050, 6), outb.shape
    assert jnp.allclose(outb, refb, atol=1e-4, rtol=1e-5), "mismatch vs reference (batched)"

    print("KERNEL_OK")
</pallas_src>

<mosaic_0001>
module attributes {stable_mosaic.version = 11 : i64} {
  func.func @dqn_mlp_kernel(%arg0: i32, %arg1: memref<8x128xf32, #tpu.memory_space<vmem>>, %arg2: memref<128x128xf32, #tpu.memory_space<vmem>>, %arg3: memref<1x128xf32, #tpu.memory_space<vmem>>, %arg4: memref<128x128xf32, #tpu.memory_space<vmem>>, %arg5: memref<1x128xf32, #tpu.memory_space<vmem>>, %arg6: memref<128x128xf32, #tpu.memory_space<vmem>>, %arg7: memref<1x128xf32, #tpu.memory_space<vmem>>, %arg8: memref<8x6xf32, #tpu.memory_space<vmem>>) attributes {dimension_semantics = [#tpu.dimension_semantics<parallel>], iteration_bounds = array<i64: 1>, scalar_prefetch = 0 : i64, scratch_operands = 0 : i64, tpu.core_type = #tpu.core_type<tc>, window_params = [{transform_indices = @transform_0, window_bounds = array<i64: 8, 128>}, {pipeline_mode = #tpu.pipeline_mode<synchronous>, transform_indices = @transform_1, window_bounds = array<i64: 128, 128>}, {pipeline_mode = #tpu.pipeline_mode<synchronous>, transform_indices = @transform_2, window_bounds = array<i64: 1, 128>}, {pipeline_mode = #tpu.pipeline_mode<synchronous>, transform_indices = @transform_3, window_bounds = array<i64: 128, 128>}, {pipeline_mode = #tpu.pipeline_mode<synchronous>, transform_indices = @transform_4, window_bounds = array<i64: 1, 128>}, {pipeline_mode = #tpu.pipeline_mode<synchronous>, transform_indices = @transform_5, window_bounds = array<i64: 128, 128>}, {pipeline_mode = #tpu.pipeline_mode<synchronous>, transform_indices = @transform_6, window_bounds = array<i64: 1, 128>}, {transform_indices = @transform_7, window_bounds = array<i64: 8, 6>}]} {
    %c0 = arith.constant 0 : index
    %c0_0 = arith.constant 0 : index
    %0 = vector.load %arg1[%c0, %c0_0] : memref<8x128xf32, #tpu.memory_space<vmem>>, vector<8x128xf32>
    %c0_1 = arith.constant 0 : index
    %c0_2 = arith.constant 0 : index
    %1 = vector.load %arg2[%c0_1, %c0_2] : memref<128x128xf32, #tpu.memory_space<vmem>>, vector<128x128xf32>
    %cst = arith.constant dense<0.000000e+00> : vector<8x128xf32>
    %2 = tpu.matmul %0, %1, %cst {dimension_numbers = #tpu.dot_dimension_numbers<[1], [0], [0], [1], [0, 0, 1, 1], [], []>} : vector<8x128xf32>, vector<128x128xf32>, vector<8x128xf32> -> vector<8x128xf32>
    %c0_3 = arith.constant 0 : index
    %c0_4 = arith.constant 0 : index
    %3 = vector.load %arg3[%c0_3, %c0_4] : memref<1x128xf32, #tpu.memory_space<vmem>>, vector<1x128xf32>
    %4 = vector.broadcast %3 : vector<1x128xf32> to vector<8x128xf32>
    %5 = arith.addf %2, %4 : vector<8x128xf32>
    %cst_5 = arith.constant 0.000000e+00 : f32
    %6 = vector.broadcast %cst_5 : f32 to vector<8x128xf32>
    %7 = arith.maximumf %5, %6 : vector<8x128xf32>
    %c0_6 = arith.constant 0 : index
    %c0_7 = arith.constant 0 : index
    %8 = vector.load %arg4[%c0_6, %c0_7] : memref<128x128xf32, #tpu.memory_space<vmem>>, vector<128x128xf32>
    %cst_8 = arith.constant dense<0.000000e+00> : vector<8x128xf32>
    %9 = tpu.matmul %7, %8, %cst_8 {dimension_numbers = #tpu.dot_dimension_numbers<[1], [0], [0], [1], [0, 0, 1, 1], [], []>} : vector<8x128xf32>, vector<128x128xf32>, vector<8x128xf32> -> vector<8x128xf32>
    %c0_9 = arith.constant 0 : index
    %c0_10 = arith.constant 0 : index
    %10 = vector.load %arg5[%c0_9, %c0_10] : memref<1x128xf32, #tpu.memory_space<vmem>>, vector<1x128xf32>
    %11 = vector.broadcast %10 : vector<1x128xf32> to vector<8x128xf32>
    %12 = arith.addf %9, %11 : vector<8x128xf32>
    %cst_11 = arith.constant 0.000000e+00 : f32
    %13 = vector.broadcast %cst_11 : f32 to vector<8x128xf32>
    %14 = arith.maximumf %12, %13 : vector<8x128xf32>
    %c0_12 = arith.constant 0 : index
    %c0_13 = arith.constant 0 : index
    %15 = vector.load %arg6[%c0_12, %c0_13] : memref<128x128xf32, #tpu.memory_space<vmem>>, vector<128x128xf32>
    %cst_14 = arith.constant dense<0.000000e+00> : vector<8x128xf32>
    %16 = tpu.matmul %14, %15, %cst_14 {dimension_numbers = #tpu.dot_dimension_numbers<[1], [0], [0], [1], [0, 0, 1, 1], [], []>} : vector<8x128xf32>, vector<128x128xf32>, vector<8x128xf32> -> vector<8x128xf32>
    %c0_15 = arith.constant 0 : index
    %c0_16 = arith.constant 0 : index
    %17 = vector.load %arg7[%c0_15, %c0_16] : memref<1x128xf32, #tpu.memory_space<vmem>>, vector<1x128xf32>
    %18 = vector.broadcast %17 : vector<1x128xf32> to vector<8x128xf32>
    %19 = arith.addf %16, %18 : vector<8x128xf32>
    %20 = vector.extract_strided_slice %19 {offsets = [0, 0], sizes = [8, 6], strides = [1, 1]} : vector<8x128xf32> to vector<8x6xf32>
    %c0_17 = arith.constant 0 : index
    %c0_18 = arith.constant 0 : index
    %21 = vector.load %arg8[%c0_17, %c0_18] : memref<8x6xf32, #tpu.memory_space<vmem>>, vector<8x6xf32>
    tpu.vector_store %arg8[%c0_17, %c0_18], %20 {strides = array<i32>} : memref<8x6xf32, #tpu.memory_space<vmem>>, vector<8x6xf32>,
    return
  }
  func.func @transform_0(%arg0: i32) -> (i32, i32) {
    %c0_i32 = arith.constant 0 : i32
    %c0_i32_0 = arith.constant 0 : i32
    return %arg0, %c0_i32 : i32, i32
  }
  func.func @transform_1(%arg0: i32) -> (i32, i32) {
    %c0_i32 = arith.constant 0 : i32
    %c0_i32_0 = arith.constant 0 : i32
    %c0_i32_1 = arith.constant 0 : i32
    return %c0_i32, %c0_i32_0 : i32, i32
  }
  func.func @transform_2(%arg0: i32) -> (i32, i32) {
    %c0_i32 = arith.constant 0 : i32
    %c0_i32_0 = arith.constant 0 : i32
    %c0_i32_1 = arith.constant 0 : i32
    return %c0_i32, %c0_i32_0 : i32, i32
  }
  func.func @transform_3(%arg0: i32) -> (i32, i32) {
    %c0_i32 = arith.constant 0 : i32
    %c0_i32_0 = arith.constant 0 : i32
    %c0_i32_1 = arith.constant 0 : i32
    return %c0_i32, %c0_i32_0 : i32, i32
  }
  func.func @transform_4(%arg0: i32) -> (i32, i32) {
    %c0_i32 = arith.constant 0 : i32
    %c0_i32_0 = arith.constant 0 : i32
    %c0_i32_1 = arith.constant 0 : i32
    return %c0_i32, %c0_i32_0 : i32, i32
  }
  func.func @transform_5(%arg0: i32) -> (i32, i32) {
    %c0_i32 = arith.constant 0 : i32
    %c0_i32_0 = arith.constant 0 : i32
    %c0_i32_1 = arith.constant 0 : i32
    return %c0_i32, %c0_i32_0 : i32, i32
  }
  func.func @transform_6(%arg0: i32) -> (i32, i32) {
    %c0_i32 = arith.constant 0 : i32
    %c0_i32_0 = arith.constant 0 : i32
    %c0_i32_1 = arith.constant 0 : i32
    return %c0_i32, %c0_i32_0 : i32, i32
  }
  func.func @transform_7(%arg0: i32) -> (i32, i32) {
    %c0_i32 = arith.constant 0 : i32
    %c0_i32_0 = arith.constant 0 : i32
    return %arg0, %c0_i32 : i32, i32
  }
}

</mosaic_0001>

<bundles_post_ra>
// kernel: tpu_custom_call.1
= control target key start
LH: loop header
LB: loop body
LE: loop exit
PB: predicated region body
PF: predicated region fallthrough
CT: control target
= control target key end

     0   :  { %12 = vsyncpa [#allocation3], 0  ;;  %s807_s0 = inlined_call_operand.hbm [shape: f32[2,128], index: 0, kind: input, shape index: {}]   ;;  %s808_s1 = inlined_call_operand.hbm [shape: f32[128,128], index: 1, kind: input, shape index: {}]   ;;  %s809_s2 = inlined_call_operand.vmem [shape: f32[1,128], index: 2, kind: input, shape index: {}]   ;;  %s810_s3 = inlined_call_operand.hbm [shape: f32[128,128], index: 3, kind: input, shape index: {}]   ;;  %s811_s4 = inlined_call_operand.vmem [shape: f32[1,128], index: 4, kind: input, shape index: {}]   ;;  %s812_s5 = inlined_call_operand.hbm [shape: f32[128,128], index: 5, kind: input, shape index: {}]   ;;  %s813_s6 = inlined_call_operand.vmem [shape: f32[1,128], index: 6, kind: input, shape index: {}]   ;;  %s814_s7 = inlined_call_operand.hbm [shape: f32[2,6], index: 7, kind: output, shape index: {}]  }
   0x1   :  { %13 = vsyncpa [#allocation6], 0 }
   0x2   :  { %14 = vsyncpa [#allocation9], 0 }
   0x3   :  { %15 = vsyncpa [#allocation4], 0 }
   0x4   :  { %20 = vsyncadd [#allocation3], 96  ;;  %s663_s24 = smov [#allocation5]  }
   0x5   :  { %s33_s25 = sshll.u32 %s663_s24, 4  ;;  %s34_s25 = int_to_ptr.vmem [resolvable:$true] %s33_s25 }
   0x6   :  { %s563_s26 = scalar_lea.vmem %s34_s25, 2048  ;;  %p568_p1 = scmp.lt.s32.totalorder %s34_s25, %s34_s25 }
   0x7   :  { %p564_p0 = scmp.ne.s32.totalorder %s34_s25, %s563_s26  ;;  %p569_p2 = scmp.lt.s32.totalorder %s563_s26, %s563_s26 }
   0x9   :  { %p570_p3 = por %p569_p2, %p568_p1 }
   0xb   :  { %p571_p4 = pnand %p570_p3, %p564_p0 }
   0xd   :  { %574 = shalt.err (!%p571_p4)
}
   0xe   :  { %s664_s27 = smov 128   ;;  %s665_s28 = smov 8  }
   0xf   :  { %39 = dma.hbm_to_vmem [thread:$0]  %s808_s1, 2048, %s34_s25, [#allocation6], %s664_s27, %s664_s27, %s665_s28  }
  0x10   :  { %s666_s8 = smov [#allocation2]  }
  0x11   :  { %s21_s9 = sshll.u32 %s666_s8, 4  ;;  %s22_s9 = int_to_ptr.vmem [resolvable:$true] %s21_s9 }
  0x12   :  { %s583_s10 = scalar_lea.vmem %s22_s9, 32  ;;  %s587_s11 = scalar_lea.vmem %s22_s9, 128 }
  0x13   :  { %p584_p5 = scmp.ne.s32.totalorder %s22_s9, %s583_s10  ;;  %p588_p6 = scmp.lt.s32.totalorder %s22_s9, %s22_s9 }
  0x14   :  { %p589_p7 = scmp.lt.s32.totalorder %s587_s11, %s583_s10 }
  0x16   :  { %p590_p8 = por %p589_p7, %p588_p6 }
  0x18   :  { %p591_p9 = pnand %p590_p8, %p584_p5 }
  0x1a   :  { %594 = shalt.err (!%p591_p9)
}
  0x1b   :  { %s667_s12 = smov 32   ;;  %s668_s13 = smov 2  }
  0x1c   :  { %27 = dma.hbm_to_vmem [thread:$0]  %s807_s0, 32, %s22_s9, [#allocation3], %s667_s12, %s667_s12, %s668_s13  }
  0x1d   :  { %s669_s1 = smov [#allocation7]   ;;  %s670_s17 = smov [#allocation8]  }
  0x1e   :  { %s47_s16 = sshll.u32 %s669_s1, 4  ;;  %s61_s18 = sshll.u32 %s670_s17, 4  ;;  %s48_s16 = int_to_ptr.vmem [resolvable:$true] %s47_s16  ;;  %s62_s18 = int_to_ptr.vmem [resolvable:$true] %s61_s18 }
  0x1f   :  { %s603_s19 = scalar_lea.vmem %s48_s16, 2048  ;;  %p608_p11 = scmp.lt.s32.totalorder %s48_s16, %s48_s16 }
  0x20   :  { %p604_p10 = scmp.ne.s32.totalorder %s48_s16, %s603_s19  ;;  %p609_p12 = scmp.lt.s32.totalorder %s603_s19, %s603_s19 }
  0x22   :  { %p610_p13 = por %p609_p12, %p608_p11 }
  0x24   :  { %p611_p0 = pnand %p610_p13, %p604_p10 }
  0x26   :  { %614 = shalt.err (!%p611_p0)
}
  0x27   :  { %53 = dma.hbm_to_vmem [thread:$0]  %s810_s3, 2048, %s48_s16, [#allocation6], %s664_s27, %s664_s27, %s665_s28  }
  0x28   :  { %s623_s0 = scalar_lea.vmem %s62_s18, 2048  ;;  %p628_p2 = scmp.lt.s32.totalorder %s62_s18, %s62_s18 }
  0x29   :  { %p624_p1 = scmp.ne.s32.totalorder %s62_s18, %s623_s0  ;;  %p629_p3 = scmp.lt.s32.totalorder %s623_s0, %s623_s0 }
  0x2b   :  { %p630_p4 = por %p629_p3, %p628_p2 }
  0x2d   :  { %p631_p5 = pnand %p630_p4, %p624_p1 }
  0x2f   :  { %634 = shalt.err (!%p631_p5)
}
  0x30   :  { %67 = dma.hbm_to_vmem [thread:$0]  %s812_s5, 2048, %s62_s18, [#allocation9], %s664_s27, %s664_s27, %s665_s28  }
  0x31   :  { %655 = dma.done.wait [#allocation3], 128  }
  0x32   :  { %656 = vsyncadd [#allocation3], 4294967168 }
  0x33   :  { %657 = dma.done.wait [#allocation6], 4096  }
  0x34   :  { %658 = vsyncadd [#allocation6], 4294963200 }
  0x35   :  { %659 = dma.done.wait [#allocation9], 2048  }
  0x36   :  { %660 = vsyncadd [#allocation9], 4294965248  ;;  %v671_v0 = vmov 0.0   ;;  %vm672_vm0 = vmmov 0   ;;  %v98_v1 = vld [vmem:[#allocation5 + $0x78] sm:$0xff]  ;;  %v97_v2 = vld [vmem:[#allocation5 + $0x70] sm:$0xff] }
  0x37   :  { %439 = vmatprep.subr.mxu0 %v671_v0  ;;  %471 = vmatprep.mubr.msk.f32.mxu0 %vm672_vm0, %v671_v0  ;;  %v96_v3 = vld [vmem:[#allocation5 + $0x68] sm:$0xff]  ;;  %v95_v4 = vld [vmem:[#allocation5 + $0x60] sm:$0xff]  ;;  %v192_v5 = vld [vmem:[#allocation7 + $0x78] sm:$0xff]  ;;  %vm364_vm1 = vcmask 48128  }
  0x38   :  { %474 = vmatprep.subr.mxu1 %v671_v0  ;;  %506 = vmatprep.mubr.msk.f32.mxu1 %vm672_vm0, %v671_v0  ;;  %v94_v6 = vld [vmem:[#allocation5 + $0x58] sm:$0xff]  ;;  %v191_v7 = vld [vmem:[#allocation7 + $0x70] sm:$0xff]  ;;  %v190_v8 = vld [vmem:[#allocation7 + $0x68] sm:$0xff] }
  0x39   :  { %440 = vmatpush3.msra.mxu0 %v98_v1  ;;  %475 = vmatpush3.msra.mxu1 %v192_v5  ;;  %v93_v9 = vld [vmem:[#allocation5 + $0x50] sm:$0xff]  ;;  %v189_v10 = vld [vmem:[#allocation7 + $0x60] sm:$0xff]  ;;  %v92_v11 = vld [vmem:[#allocation5 + $0x48] sm:$0xff] }
  0x3a   :  { %441 = vmatprep.subr.mxu0 %v671_v0  ;;  %476 = vmatprep.subr.mxu1 %v671_v0  ;;  %v188_v12 = vld [vmem:[#allocation7 + $0x58] sm:$0xff]  ;;  %v91_v13 = vld [vmem:[#allocation5 + $0x40] sm:$0xff]  ;;  %v187_v14 = vld [vmem:[#allocation7 + $0x50] sm:$0xff] }
  0x3b   :  { %442 = vmatpush3.msra.mxu0 %v97_v2  ;;  %477 = vmatpush3.msra.mxu1 %v191_v7  ;;  %v90_v15 = vld [vmem:[#allocation5 + $0x38] sm:$0xff]  ;;  %v186_v16 = vld [vmem:[#allocation7 + $0x48] sm:$0xff]  ;;  %v89_v17 = vld [vmem:[#allocation5 + $0x30] sm:$0xff] }
  0x3c   :  { %443 = vmatprep.subr.mxu0 %v671_v0  ;;  %478 = vmatprep.subr.mxu1 %v671_v0  ;;  %v185_v18 = vld [vmem:[#allocation7 + $0x40] sm:$0xff]  ;;  %v88_v19 = vld [vmem:[#allocation5 + $0x28] sm:$0xff]  ;;  %v184_v20 = vld [vmem:[#allocation7 + $0x38] sm:$0xff] }
  0x3d   :  { %444 = vmatpush3.msra.mxu0 %v96_v3  ;;  %479 = vmatpush3.msra.mxu1 %v190_v8  ;;  %v87_v21 = vld [vmem:[#allocation5 + $0x20] sm:$0xff]  ;;  %v183_v22 = vld [vmem:[#allocation7 + $0x30] sm:$0xff]  ;;  %v86_v23 = vld [vmem:[#allocation5 + $0x18] sm:$0xff] }
  0x3e   :  { %445 = vmatprep.subr.mxu0 %v671_v0  ;;  %480 = vmatprep.subr.mxu1 %v671_v0  ;;  %v182_v24 = vld [vmem:[#allocation7 + $0x28] sm:$0xff]  ;;  %v85_v25 = vld [vmem:[#allocation5 + $0x10] sm:$0xff]  ;;  %v181_v26 = vld [vmem:[#allocation7 + $0x20] sm:$0xff] }
  0x3f   :  { %446 = vmatpush3.msra.mxu0 %v95_v4  ;;  %481 = vmatpush3.msra.mxu1 %v189_v10  ;;  %v84_v27 = vld [vmem:[#allocation5 + $0x8] sm:$0xff]  ;;  %v180_v28 = vld [vmem:[#allocation7 + $0x18] sm:$0xff]  ;;  %v83_v29 = vld [vmem:[#allocation5] sm:$0xff] }
  0x40   :  { %447 = vmatprep.subr.mxu0 %v671_v0  ;;  %482 = vmatprep.subr.mxu1 %v671_v0  ;;  %v82_v30 = vld [vmem:[#allocation2] sm:$0xff]  ;;  %v179_v31 = vld [vmem:[#allocation7 + $0x10] sm:$0xff]  ;;  %v178_v32 = vld [vmem:[#allocation7 + $0x8] sm:$0xff] }
  0x41   :  { %448 = vmatpush3.msra.mxu0 %v94_v6  ;;  %483 = vmatpush3.msra.mxu1 %v188_v12  ;;  %v177_v33 = vld [vmem:[#allocation7] sm:$0xff]  ;;  %v286_v34 = vld [vmem:[#allocation8 + $0x78] sm:$0xff]  ;;  %v285_v35 = vld [vmem:[#allocation8 + $0x70] sm:$0xff] }
  0x42   :  { %449 = vmatprep.subr.mxu0 %v671_v0  ;;  %484 = vmatprep.subr.mxu1 %v671_v0  ;;  %v284_v36 = vld [vmem:[#allocation8 + $0x68] sm:$0xff]  ;;  %v283_v37 = vld [vmem:[#allocation8 + $0x60] sm:$0xff]  ;;  %v282_v38 = vld [vmem:[#allocation8 + $0x58] sm:$0xff] }
  0x43   :  { %450 = vmatpush3.msra.mxu0 %v93_v9  ;;  %485 = vmatpush3.msra.mxu1 %v187_v14  ;;  %v281_v39 = vld [vmem:[#allocation8 + $0x50] sm:$0xff]  ;;  %v280_v40 = vld [vmem:[#allocation8 + $0x48] sm:$0xff]  ;;  %v279_v41 = vld [vmem:[#allocation8 + $0x40] sm:$0xff] }
  0x44   :  { %451 = vmatprep.subr.mxu0 %v671_v0  ;;  %486 = vmatprep.subr.mxu1 %v671_v0  ;;  %v278_v42 = vld [vmem:[#allocation8 + $0x38] sm:$0xff]  ;;  %v277_v43 = vld [vmem:[#allocation8 + $0x30] sm:$0xff]  ;;  %v276_v44 = vld [vmem:[#allocation8 + $0x28] sm:$0xff] }
  0x45   :  { %452 = vmatpush3.msra.mxu0 %v92_v11  ;;  %487 = vmatpush3.msra.mxu1 %v186_v16  ;;  %v275_v45 = vld [vmem:[#allocation8 + $0x20] sm:$0xff]  ;;  %v274_v46 = vld [vmem:[#allocation8 + $0x18] sm:$0xff]  ;;  %v273_v52 = vld [vmem:[#allocation8 + $0x10] sm:$0xff] }
  0x46   :  { %453 = vmatprep.subr.mxu0 %v671_v0  ;;  %488 = vmatprep.subr.mxu1 %v671_v0  ;;  %v385_v47 = vld [vmem:[%s809_s2] ss:$0 sm:$0xff]  ;;  %v272_v53 = vld [vmem:[#allocation8 + $0x8] sm:$0xff]  ;;  %v271_v54 = vld [vmem:[#allocation8] sm:$0xff] }
  0x47   :  { %454 = vmatpush3.msra.mxu0 %v91_v13  ;;  %489 = vmatpush3.msra.mxu1 %v185_v18  ;;  %v386_v55 = vld [vmem:[%s811_s4] ss:$0 sm:$0xff] }
  0x48   :  { %455 = vmatprep.subr.mxu0 %v671_v0  ;;  %490 = vmatprep.subr.mxu1 %v671_v0  ;;  %v387_v60 = vld [vmem:[%s813_s6] ss:$0 sm:$0xff] }
  0x49   :  { %456 = vmatpush3.msra.mxu0 %v90_v15  ;;  %491 = vmatpush3.msra.mxu1 %v184_v20 }
  0x4a   :  { %457 = vmatprep.subr.mxu0 %v671_v0  ;;  %492 = vmatprep.subr.mxu1 %v671_v0 }
  0x4b   :  { %458 = vmatpush3.msra.mxu0 %v89_v17  ;;  %493 = vmatpush3.msra.mxu1 %v183_v22 }
  0x4c   :  { %459 = vmatprep.subr.mxu0 %v671_v0  ;;  %494 = vmatprep.subr.mxu1 %v671_v0 }
  0x4d   :  { %460 = vmatpush3.msra.mxu0 %v88_v19  ;;  %495 = vmatpush3.msra.mxu1 %v182_v24 }
  0x4e   :  { %461 = vmatprep.subr.mxu0 %v671_v0  ;;  %496 = vmatprep.subr.mxu1 %v671_v0 }
  0x4f   :  { %462 = vmatpush3.msra.mxu0 %v87_v21  ;;  %497 = vmatpush3.msra.mxu1 %v181_v26 }
  0x50   :  { %463 = vmatprep.subr.mxu0 %v671_v0  ;;  %498 = vmatprep.subr.mxu1 %v671_v0 }
  0x51   :  { %464 = vmatpush3.msra.mxu0 %v86_v23  ;;  %499 = vmatpush3.msra.mxu1 %v180_v28 }
  0x52   :  { %465 = vmatprep.subr.mxu0 %v671_v0  ;;  %500 = vmatprep.subr.mxu1 %v671_v0 }
  0x53   :  { %466 = vmatpush3.msra.mxu0 %v85_v25  ;;  %501 = vmatpush3.msra.mxu1 %v179_v31 }
  0x54   :  { %467 = vmatprep.subr.mxu0 %v671_v0  ;;  %502 = vmatprep.subr.mxu1 %v671_v0 }
  0x55   :  { %468 = vmatpush3.msra.mxu0 %v84_v27  ;;  %503 = vmatpush3.msra.mxu1 %v178_v32 }
  0x56   :  { %469 = vmatprep.subr.mxu0 %v671_v0  ;;  %504 = vmatprep.subr.mxu1 %v671_v0 }
  0x57   :  { %470 = vmatpush3.msra.mxu0 %v83_v29  ;;  %505 = vmatpush3.msra.mxu1 %v177_v33 }
  0x58   :  { %472 = vmatmul.mubr.f32.vlgmr.msra.gmra.mxu0 %v82_v30  ;;  %509 = vmatprep.subr.mxu0 %v671_v0 }
  0x59   :  { %541 = vmatprep.mubr.msk.f32.mxu0 %vm672_vm0, %v671_v0  ;;  %510 = vmatpush3.msra.mxu0 %v286_v34 }
  0x5a   :  { %511 = vmatprep.subr.mxu0 %v671_v0 }
  0x5b   :  { %512 = vmatpush3.msra.mxu0 %v285_v35 }
  0x5c   :  { %513 = vmatprep.subr.mxu0 %v671_v0 }
  0x5d   :  { %514 = vmatpush3.msra.mxu0 %v284_v36 }
  0x5e   :  { %515 = vmatprep.subr.mxu0 %v671_v0 }
  0x5f   :  { %516 = vmatpush3.msra.mxu0 %v283_v37 }
  0x60   :  { %517 = vmatprep.subr.mxu0 %v671_v0 }
  0x61   :  { %518 = vmatpush3.msra.mxu0 %v282_v38 }
  0x62   :  { %519 = vmatprep.subr.mxu0 %v671_v0 }
  0x63   :  { %520 = vmatpush3.msra.mxu0 %v281_v39 }
  0x64   :  { %521 = vmatprep.subr.mxu0 %v671_v0 }
  0x65   :  { %522 = vmatpush3.msra.mxu0 %v280_v40 }
  0x66   :  { %523 = vmatprep.subr.mxu0 %v671_v0 }
  0x67   :  { %524 = vmatpush3.msra.mxu0 %v279_v41 }
  0x68   :  { %525 = vmatprep.subr.mxu0 %v671_v0 }
  0x69   :  { %526 = vmatpush3.msra.mxu0 %v278_v42 }
  0x6a   :  { %527 = vmatprep.subr.mxu0 %v671_v0 }
  0x6b   :  { %528 = vmatpush3.msra.mxu0 %v277_v43 }
  0x6c   :  { %529 = vmatprep.subr.mxu0 %v671_v0 }
  0x6d   :  { %530 = vmatpush3.msra.mxu0 %v276_v44 }
  0x6e   :  { %531 = vmatprep.subr.mxu0 %v671_v0 }
  0x6f   :  { %532 = vmatpush3.msra.mxu0 %v275_v45 }
  0x70   :  { %533 = vmatprep.subr.mxu0 %v671_v0 }
  0x71   :  { %534 = vmatpush3.msra.mxu0 %v274_v46 }
  0x72   :  { %535 = vmatprep.subr.mxu0 %v671_v0 }
  0x73   :  { %536 = vmatpush3.msra.mxu0 %v273_v52 }
  0x74   :  { %537 = vmatprep.subr.mxu0 %v671_v0 }
  0x75   :  { %538 = vmatpush3.msra.mxu0 %v272_v53 }
  0x76   :  { %539 = vmatprep.subr.mxu0 %v671_v0 }
  0x77   :  { %540 = vmatpush3.msra.mxu0 %v271_v54 }
 0x118   :  { %v172_v48 = vpop.f32.mrf.mxu0 }
 0x119   :  { %v173_v49 = vadd.f32 %v385_v47, %v172_v48 }
 0x11a   :  { %v473_v50 = vpop.f32.mrf.mxu0 }
 0x11b   :  { %v176_v51 = vmax.f32 %v173_v49, 0.0 }
 0x11d   :  { %507 = vmatmul.mubr.f32.vlgmr.msra.gmra.mxu1 %v176_v51 }
 0x1dd   :  { %v266_v56 = vpop.f32.mrf.mxu1 }
 0x1de   :  { %v267_v57 = vadd.f32 %v386_v55, %v266_v56 }
 0x1df   :  { %v508_v58 = vpop.f32.mrf.mxu1 }
 0x1e0   :  { %v270_v59 = vmax.f32 %v267_v57, 0.0 }
 0x1e2   :  { %542 = vmatmul.mubr.f32.vlgmr.msra.gmra.mxu0 %v270_v59 }
 0x2a2   :  { %v360_v61 = vpop.f32.mrf.mxu0 }
 0x2a3   :  { %v361_v62 = vadd.f32 %v387_v60, %v360_v61 }
 0x2a4   :  { %v543_v63 = vpop.f32.mrf.mxu0 }
 0x2a5   :  { %365 = vst.msk [vmem:[#allocation10] sm:$0xff] %vm364_vm1, %v361_v62 }
 0x2a6   :  { %370 = vsyncadd [#allocation4], 96  ;;  %s673_s27 = smov [#allocation10]  }
 0x2a7   :  { %s371_s28 = sshll.u32 %s673_s27, 4  ;;  %s372_s28 = int_to_ptr.vmem [resolvable:$true] %s371_s28 }
 0x2a8   :  { %s635_s29 = scalar_lea.vmem %s372_s28, 32  ;;  %s639_s4 = scalar_lea.vmem %s372_s28, 128 }
 0x2a9   :  { %p636_p6 = scmp.ne.s32.totalorder %s372_s28, %s635_s29  ;;  %p640_p7 = scmp.lt.s32.totalorder %s372_s28, %s372_s28 }
 0x2aa   :  { %p641_p8 = scmp.lt.s32.totalorder %s639_s4, %s635_s29 }
 0x2ac   :  { %p642_p9 = por %p641_p8, %p640_p7 }
 0x2ae   :  { %p643_p10 = pnand %p642_p9, %p636_p6 }
 0x2b0   :  { %646 = shalt.err (!%p643_p10)
}
 0x2b1   :  { %377 = dma.vmem_to_hbm [thread:$0]  %s372_s28, 32, %s814_s7, [#allocation4], %s667_s12, %s667_s12, %s668_s13  }
 0x2b2   :  { %661 = dma.done.wait [#allocation4], 128  }
 0x2b3   :  { %662 = vsyncadd [#allocation4], 4294967168 }
 0x2b4   :  { %381 = vsyncpa [#allocation3], 1 }
 0x2b5   :  { %382 = vsyncpa [#allocation6], 1 }
 0x2b6   :  { %383 = vsyncpa [#allocation9], 1 }
 0x2b7   :  { %384 = vsyncpa [#allocation4], 1 }

</bundles_post_ra>
